<compile_context>
chip_gen: v7x
topology: tpu7x:2x2x1
jax: 0.10.0
libtpu: 0.0.40
codegen_flags: <defaults>
</compile_context>

<pallas_src>
import functools

import jax
import jax.numpy as jnp
from jax import lax
from jax.experimental import pallas as pl
from jax.experimental.pallas import tpu as pltpu


def patch_merging_kernel(x_ref, g_ref, b_ref, w_ref, bias_ref, o_ref, *, eps):
    # x_ref   : (tm, 4C)  merged-patch rows (torch concat order along channels)
    # g_ref   : (1, 4C)   LayerNorm gamma (f32)
    # b_ref   : (1, 4C)   LayerNorm beta  (f32)
    # w_ref   : (4C, 2C)  reduction weight = torch_weight.T, staged as bf16
    # bias_ref: (1, 2C)   reduction bias (f32)
    # o_ref   : (tm, 2C)
    x = x_ref[...].astype(jnp.float32)

    # ---- LayerNorm over the lane axis (4C), f32 statistics (biased var) ----
    mu = jnp.mean(x, axis=-1, keepdims=True)           # XLU cross-lane reduce
    xc = x - mu
    var = jnp.mean(xc * xc, axis=-1, keepdims=True)
    inv = lax.rsqrt(var + eps)                          # EUP slot, near-free
    xn = xc * inv * g_ref[...] + b_ref[...]

    # ---- Linear 4C -> 2C: single MXU matmul, bf16 operands, f32 accumulate ----
    y = jnp.dot(xn.astype(w_ref.dtype), w_ref[...],
                preferred_element_type=jnp.float32)
    y = y + bias_ref[...]
    o_ref[...] = y.astype(o_ref.dtype)


def _pick_row_tile(total_rows, c4, c2, *, min_steps=4,
                   vmem_budget=24 * 1024 * 1024):
    """Largest (8,128)-friendly row tile that (a) divides total_rows,
    (b) leaves enough grid steps to pipeline DMA / feed both v7x cores and
    (c) keeps double-buffered tiles + resident weight inside the VMEM budget."""
    def fits(tm):
        tile_bytes = 2 * (tm * c4 * 4 + tm * c2 * 4)        # dbl-buffered in/out
        resident = c4 * c2 * 2 + (2 * c4 + c2) * 4          # bf16 W + f32 params
        return tile_bytes + resident <= vmem_budget

    candidates = (2048, 1024, 512, 256, 128, 64, 32, 16, 8)
    for tm in candidates:
        if (tm <= total_rows and total_rows % tm == 0
                and total_rows // tm >= min_steps and fits(tm)):
            return tm
    for tm in candidates:
        if tm <= total_rows and total_rows % tm == 0 and fits(tm):
            return tm
    return total_rows  # single step; block equals full array dims (allowed)


def patch_merging_forward(x, gamma, beta, w_red_t, b_red, *, eps=1e-5):
    """x: (B, H, W, C) -> (B, H//2, W//2, 2C), matching the PyTorch module.

    w_red_t is the reduction weight already transposed to (4C, 2C)
    (i.e. torch nn.Linear.weight.T); b_red is (2C,).
    """
    B, H, W, C = x.shape
    assert H % 2 == 0 and W % 2 == 0, "Height and Width must be even."
    Ho, Wo = H // 2, W // 2
    C4, C2 = 4 * C, 2 * C

    # 2x2 space-to-depth with the exact torch concat order [x0, x1, x2, x3]:
    # for x[b, 2i+r, 2j+s, c] the merged channel index is (2*s + r)*C + c.
    xr = x.reshape(B, Ho, 2, Wo, 2, C)
    xm = jnp.transpose(xr, (0, 1, 3, 4, 2, 5)).reshape(B * Ho * Wo, C4)

    total = B * Ho * Wo
    tm = _pick_row_tile(total, C4, C2)
    grid = (total // tm,)

    w_bf16 = w_red_t.astype(jnp.bfloat16)              # MXU-native operand dtype
    gamma2 = gamma.reshape(1, C4).astype(jnp.float32)
    beta2 = beta.reshape(1, C4).astype(jnp.float32)
    bias2 = b_red.reshape(1, C2).astype(jnp.float32)

    kernel = functools.partial(patch_merging_kernel, eps=eps)

    out = pl.pallas_call(
        kernel,
        out_shape=jax.ShapeDtypeStruct((total, C2), x.dtype),
        grid_spec=pltpu.PrefetchScalarGridSpec(
            num_scalar_prefetch=0,
            grid=grid,
            in_specs=[
                pl.BlockSpec((tm, C4), lambda i: (i, 0)),   # activations (tiled rows)
                pl.BlockSpec((1, C4), lambda i: (0, 0)),    # gamma (resident)
                pl.BlockSpec((1, C4), lambda i: (0, 0)),    # beta  (resident)
                pl.BlockSpec((C4, C2), lambda i: (0, 0)),   # weight (resident)
                pl.BlockSpec((1, C2), lambda i: (0, 0)),    # bias  (resident)
            ],
            out_specs=pl.BlockSpec((tm, C2), lambda i: (i, 0)),
        ),
        compiler_params=pltpu.CompilerParams(
            dimension_semantics=("parallel",)),
    )(xm, gamma2, beta2, w_bf16, bias2)

    return out.reshape(B, Ho, Wo, C2)


def init_params(key, patch_dim):
    """Deterministic synthetic parameters in PyTorch layouts."""
    C4, C2 = 4 * patch_dim, 2 * patch_dim
    k1, k2, k3, k4 = jax.random.split(key, 4)
    gamma = 1.0 + 0.1 * jax.random.normal(k1, (C4,), jnp.float32)
    beta = 0.1 * jax.random.normal(k2, (C4,), jnp.float32)
    w_pt = jax.random.normal(k3, (C2, C4), jnp.float32) / jnp.sqrt(C4)  # (out, in)
    b_pt = 0.1 * jax.random.normal(k4, (C2,), jnp.float32)
    return gamma, beta, w_pt, b_pt


def reference_forward(x, gamma, beta, w_pt, b_pt, eps=1e-5):
    """Pure-JAX (f32) reference reproducing the PyTorch forward exactly."""
    B, H, W, C = x.shape
    x0 = x[:, 0::2, 0::2, :]
    x1 = x[:, 1::2, 0::2, :]
    x2 = x[:, 0::2, 1::2, :]
    x3 = x[:, 1::2, 1::2, :]
    xc = jnp.concatenate([x0, x1, x2, x3], axis=-1).reshape(B, -1, 4 * C)
    mu = jnp.mean(xc, axis=-1, keepdims=True)
    var = jnp.mean((xc - mu) ** 2, axis=-1, keepdims=True)
    xn = (xc - mu) / jnp.sqrt(var + eps) * gamma + beta
    y = xn @ w_pt.T + b_pt
    return y.reshape(B, H // 2, W // 2, 2 * C)


if __name__ == "__main__":
    # patch_dim = 64  ->  4C = 256, 2C = 128: all lane-dense, MXU-friendly.
    B, H, W, C = 2, 16, 16, 64
    key = jax.random.PRNGKey(0)
    kx, kp = jax.random.split(key)
    x = jax.random.normal(kx, (B, H, W, C), jnp.float32)
    gamma, beta, w_pt, b_pt = init_params(kp, C)

    out = patch_merging_forward(x, gamma, beta, w_pt.T, b_pt)
    out = jax.block_until_ready(out)

    ref = reference_forward(x, gamma, beta, w_pt, b_pt)
    assert out.shape == (B, H // 2, W // 2, 2 * C)
    max_err = jnp.max(jnp.abs(out - ref))
    # bf16 matmul operands with f32 accumulation -> ~1e-3..1e-2 abs deviation.
    assert jnp.allclose(out, ref, rtol=2e-2, atol=2e-2), f"max abs err = {max_err}"

    print("KERNEL_OK")
</pallas_src>

<mosaic_0001>
module attributes {stable_mosaic.version = 11 : i64} {
  func.func @patch_merging_kernel(%arg0: i32, %arg1: memref<32x256xf32, #tpu.memory_space<vmem>>, %arg2: memref<1x256xf32, #tpu.memory_space<vmem>>, %arg3: memref<1x256xf32, #tpu.memory_space<vmem>>, %arg4: memref<256x128xbf16, #tpu.memory_space<vmem>>, %arg5: memref<1x128xf32, #tpu.memory_space<vmem>>, %arg6: memref<32x128xf32, #tpu.memory_space<vmem>>) attributes {dimension_semantics = [#tpu.dimension_semantics<parallel>], iteration_bounds = array<i64: 4>, scalar_prefetch = 0 : i64, scratch_operands = 0 : i64, tpu.core_type = #tpu.core_type<tc>, window_params = [{transform_indices = @transform_0, window_bounds = array<i64: 32, 256>}, {pipeline_mode = #tpu.pipeline_mode<synchronous>, transform_indices = @transform_1, window_bounds = array<i64: 1, 256>}, {pipeline_mode = #tpu.pipeline_mode<synchronous>, transform_indices = @transform_2, window_bounds = array<i64: 1, 256>}, {pipeline_mode = #tpu.pipeline_mode<synchronous>, transform_indices = @transform_3, window_bounds = array<i64: 256, 128>}, {pipeline_mode = #tpu.pipeline_mode<synchronous>, transform_indices = @transform_4, window_bounds = array<i64: 1, 128>}, {transform_indices = @transform_5, window_bounds = array<i64: 32, 128>}]} {
    %c0 = arith.constant 0 : index
    %c0_0 = arith.constant 0 : index
    %0 = vector.load %arg1[%c0, %c0_0] : memref<32x256xf32, #tpu.memory_space<vmem>>, vector<32x256xf32>
    %cst = arith.constant dense<0.000000e+00> : vector<32xf32>
    %1 = vector.multi_reduction <add>, %0, %cst [1] : vector<32x256xf32> to vector<32xf32>
    %2 = vector.shape_cast %1 : vector<32xf32> to vector<32x1xf32>
    %cst_1 = arith.constant 2.560000e+02 : f32
    %3 = vector.broadcast %cst_1 : f32 to vector<32x1xf32>
    %4 = arith.divf %2, %3 : vector<32x1xf32>
    %5 = vector.broadcast %4 : vector<32x1xf32> to vector<32x256xf32>
    %6 = arith.subf %0, %5 : vector<32x256xf32>
    %7 = arith.mulf %6, %6 : vector<32x256xf32>
    %cst_2 = arith.constant dense<0.000000e+00> : vector<32xf32>
    %8 = vector.multi_reduction <add>, %7, %cst_2 [1] : vector<32x256xf32> to vector<32xf32>
    %9 = vector.shape_cast %8 : vector<32xf32> to vector<32x1xf32>
    %cst_3 = arith.constant 2.560000e+02 : f32
    %10 = vector.broadcast %cst_3 : f32 to vector<32x1xf32>
    %11 = arith.divf %9, %10 : vector<32x1xf32>
    %cst_4 = arith.constant 9.99999974E-6 : f32
    %12 = vector.broadcast %cst_4 : f32 to vector<32x1xf32>
    %13 = arith.addf %11, %12 : vector<32x1xf32>
    %14 = math.rsqrt %13 : vector<32x1xf32>
    %15 = vector.broadcast %14 : vector<32x1xf32> to vector<32x256xf32>
    %16 = arith.mulf %6, %15 : vector<32x256xf32>
    %c0_5 = arith.constant 0 : index
    %c0_6 = arith.constant 0 : index
    %17 = vector.load %arg2[%c0_5, %c0_6] : memref<1x256xf32, #tpu.memory_space<vmem>>, vector<1x256xf32>
    %18 = vector.broadcast %17 : vector<1x256xf32> to vector<32x256xf32>
    %19 = arith.mulf %16, %18 : vector<32x256xf32>
    %c0_7 = arith.constant 0 : index
    %c0_8 = arith.constant 0 : index
    %20 = vector.load %arg3[%c0_7, %c0_8] : memref<1x256xf32, #tpu.memory_space<vmem>>, vector<1x256xf32>
    %21 = vector.broadcast %20 : vector<1x256xf32> to vector<32x256xf32>
    %22 = arith.addf %19, %21 : vector<32x256xf32>
    %23 = arith.truncf %22 : vector<32x256xf32> to vector<32x256xbf16>
    %c0_9 = arith.constant 0 : index
    %c0_10 = arith.constant 0 : index
    %24 = vector.load %arg4[%c0_9, %c0_10] : memref<256x128xbf16, #tpu.memory_space<vmem>>, vector<256x128xbf16>
    %cst_11 = arith.constant dense<0.000000e+00> : vector<32x128xf32>
    %25 = tpu.matmul %23, %24, %cst_11 {dimension_numbers = #tpu.dot_dimension_numbers<[1], [0], [0], [1], [0, 0, 1, 1], [], []>} : vector<32x256xbf16>, vector<256x128xbf16>, vector<32x128xf32> -> vector<32x128xf32>
    %c0_12 = arith.constant 0 : index
    %c0_13 = arith.constant 0 : index
    %26 = vector.load %arg5[%c0_12, %c0_13] : memref<1x128xf32, #tpu.memory_space<vmem>>, vector<1x128xf32>
    %27 = vector.broadcast %26 : vector<1x128xf32> to vector<32x128xf32>
    %28 = arith.addf %25, %27 : vector<32x128xf32>
    %c0_14 = arith.constant 0 : index
    %c0_15 = arith.constant 0 : index
    %29 = vector.load %arg6[%c0_14, %c0_15] : memref<32x128xf32, #tpu.memory_space<vmem>>, vector<32x128xf32>
    tpu.vector_store %arg6[%c0_14, %c0_15], %28 {strides = array<i32>} : memref<32x128xf32, #tpu.memory_space<vmem>>, vector<32x128xf32>,
    return
  }
  func.func @transform_0(%arg0: i32) -> (i32, i32) {
    %c0_i32 = arith.constant 0 : i32
    %c0_i32_0 = arith.constant 0 : i32
    return %arg0, %c0_i32 : i32, i32
  }
  func.func @transform_1(%arg0: i32) -> (i32, i32) {
    %c0_i32 = arith.constant 0 : i32
    %c0_i32_0 = arith.constant 0 : i32
    %c0_i32_1 = arith.constant 0 : i32
    return %c0_i32, %c0_i32_0 : i32, i32
  }
  func.func @transform_2(%arg0: i32) -> (i32, i32) {
    %c0_i32 = arith.constant 0 : i32
    %c0_i32_0 = arith.constant 0 : i32
    %c0_i32_1 = arith.constant 0 : i32
    return %c0_i32, %c0_i32_0 : i32, i32
  }
  func.func @transform_3(%arg0: i32) -> (i32, i32) {
    %c0_i32 = arith.constant 0 : i32
    %c0_i32_0 = arith.constant 0 : i32
    %c0_i32_1 = arith.constant 0 : i32
    return %c0_i32, %c0_i32_0 : i32, i32
  }
  func.func @transform_4(%arg0: i32) -> (i32, i32) {
    %c0_i32 = arith.constant 0 : i32
    %c0_i32_0 = arith.constant 0 : i32
    %c0_i32_1 = arith.constant 0 : i32
    return %c0_i32, %c0_i32_0 : i32, i32
  }
  func.func @transform_5(%arg0: i32) -> (i32, i32) {
    %c0_i32 = arith.constant 0 : i32
    %c0_i32_0 = arith.constant 0 : i32
    return %arg0, %c0_i32 : i32, i32
  }
}

</mosaic_0001>

<bundles_post_ra>
// kernel: tpu_custom_call.1
= control target key start
LH: loop header
LB: loop body
LE: loop exit
PB: predicated region body
PF: predicated region fallthrough
CT: control target
= control target key end

     0   :  { %10 = vsyncpa [#allocation3], 0  ;;  %s1243_s0 = inlined_call_operand.hbm [shape: f32[128,256], index: 0, kind: input, shape index: {}]   ;;  %s1244_s1 = inlined_call_operand.vmem [shape: f32[1,256], index: 1, kind: input, shape index: {}]   ;;  %s1245_s2 = inlined_call_operand.vmem [shape: f32[1,256], index: 2, kind: input, shape index: {}]   ;;  %s1246_s3 = inlined_call_operand.hbm [shape: bf16[256,128], index: 3, kind: input, shape index: {}]   ;;  %s1247_s4 = inlined_call_operand.vmem [shape: f32[1,128], index: 4, kind: input, shape index: {}]   ;;  %s1248_s5 = inlined_call_operand.hbm [shape: f32[128,128], index: 5, kind: output, shape index: {}]  }
   0x1   :  { %12 = vsyncpa [#allocation3 + $0x1], 0 }
   0x2   :  { %13 = vsyncpa [#allocation6], 0 }
   0x3   :  { %14 = vsyncpa [#allocation4], 0 }
   0x4   :  { %16 = vsyncpa [#allocation4 + $0x1], 0  ;;  %s1001_s18 = smov 0   ;;  %s1003_s19 = smov 0  }
   0x5   :  { %s1005_s20 = smov 0   ;;  %s1007_s21 = smov 0  }
   0x6 LB: > { %s1022_s22 = sadd.s32 4294967295, %s960_s21   ;;  %s664_s23 = sadd.s32 4294967294, %s960_s21   ;;  %s960_s21 = sphi %s1007_s21, %s1267_s21   ;;  %s956_s20 = sphi %s1005_s20, %s1266_s20   ;;  %s952_s19 = sphi %s1003_s19, %s1265_s19   ;;  %s948_s18 = sphi %s1001_s18, %s1264_s18  }
   0x7   : > { %p42_p0 = scmp.ne.s32.totalorder %s952_s19, %s948_s18  ;;  %p1249_p1 = scmp.eq.s32.totalorder %s1022_s22, 0 }
   0x8   : > { %p156_p3 = scmp.eq.s32.totalorder %s664_s23, 3  ;;  %p665_p5 = scmp.ge.s32.totalorder %s960_s21, 1 }
   0x9   : > { %p1031_p4 = por %p1249_p1, %p42_p0  ;;  %p163_p7 = scmp.lt.s32.totalorder %s960_s21, 5 }
   0xa   : > { %p1036_p6 = por %p156_p3, %p42_p0  ;;  %s962_s27 = smov [#allocation5]  }
   0xb   : > { %s1252_s24 = scalar_select %p1031_p4, 1, 0 }
   0xc   : > { %s1253_s25 = scalar_select %p1036_p6, 1, 0 }
   0xd   : > { %p1041_p8 = pnand %p665_p5, %p163_p7  ;;  %s181_s28 = sshll.u32 %s962_s27, 4  ;;  %s182_s28 = int_to_ptr.vmem [resolvable:$true] %s181_s28 }
   0xe   : > { %s1054_s30 = sadd.s32 1, %s960_s21   ;;  %s29_s6 = sadd.s32 1, %s956_s20 }
   0xf   : > { %s1254_s26 = scalar_select %p1041_p8, 1, 0 }
  0x10   : > { %p753_p9 = pneg %p1041_p8  ;;  %s26_s7 = ssub.s32 %s960_s21, %s1054_s30 }
  0x11   : > { %s832_s10 = scalar_lea.hbm %s1246_s3, 2048 }
  0x12   : > { %p1049_p10 = pnand %p753_p9, %p1249_p1  ;;  %p833_p11 = scmp.ne.s32.totalorder %s1246_s3, %s832_s10 }
  0x13   : > { %p839_p3 = scmp.lt.u32.totalorder %s832_s10, %s1246_s3 }
  0x14   : > { %p834_p12 = pneg %p1049_p10 }
  0x16   : > { %p835_p13 = pnand %p834_p12, %p833_p11 }
  0x18   : > { %p836_p0 = pneg %p835_p13 }
  0x1a   : > { %p841_p5 = pnand %p839_p3, %p836_p0 }
  0x1c   : > { %844 = shalt.err (!%p841_p5)
}
  0x1d   : > { %s845_s15 = scalar_lea.vmem %s182_s28, 2048  ;;  %p853_p2 = scmp.lt.s32.totalorder %s182_s28, %s182_s28 }
  0x1e   : > { %p846_p7 = scmp.ne.s32.totalorder %s182_s28, %s845_s15  ;;  %p854_p6 = scmp.lt.s32.totalorder %s845_s15, %s845_s15 }
  0x20   : > { %p848_p9 = pnand %p846_p7, %p834_p12  ;;  %p855_p4 = por %p854_p6, %p853_p2 }
  0x22   : > { %p849_p1 = pneg %p848_p9 }
  0x24   : > { %p856_p8 = pnand %p855_p4, %p849_p1 }
  0x26   : > { %859 = shalt.err (!%p856_p8)
}
  0x27   : > { %s963_s16 = smov 64   ;;  %s964_s17 = smov 4  }
  0x28   : > { %756 = dma.hbm_to_vmem [thread:$0]  (!%p1049_p10), %s1246_s3, 2048, %s182_s28, [#allocation6], %s963_s16, %s963_s16, %s964_s17  }
  0x29   : > { %p27_p11 = scmp.eq.s32.totalorder %s26_s7, 0  ;;  %p36_p2 = scmp.ne.s32.totalorder %s956_s20, %s952_s19 }
  0x2a   : > { %p37_p1 = scmp.eq.s32.totalorder %s960_s21, 0  ;;  %p766_p4 = scmp.lt.s32.totalorder %s960_s21, 4 }
  0x2b   : > { %s1080_s8 = scalar_select %p27_p11, %s956_s20, %s29_s6  }
  0x2c   : > { %p38_p6 = por %p37_p1, %p36_p2  ;;  %p1256_p8 = scmp.eq.s32.totalorder %s1022_s22, 3 }
  0x2d   : > { %s198_s10 = sand.u32 1, %s956_s20   ;;  %s699_s11 = sshll.u32 %s960_s21, 10 }
  0x2e   : > { %p1084_p12 = por %p1256_p8, %p36_p2  ;;  %s668_s12 = sshll.u32 %s198_s10, 6 }
  0x2f   : > { %s1093_s14 = scalar_lea.hbm %s1243_s0, %s699_s11  ;;  %s202_s28 = scalar_lea.vmem [#allocation2], %s668_s12 }
  0x30   : > { %s210_s6 = sshll.u32 %s202_s28, 4  ;;  %p1095_p10 = pnand %p766_p4, %p38_p6  ;;  %s1099_s6 = int_to_ptr.vmem [resolvable:$true] %s210_s6 }
  0x31   : > { %s1101_s15 = scalar_lea.sflag [#allocation3], %s198_s10  ;;  %s860_s16 = scalar_lea.hbm %s1093_s14, 1024 }
  0x32   : > { %p861_p13 = scmp.ne.s32.totalorder %s1093_s14, %s860_s16  ;;  %p862_p0 = pneg %p1095_p10 }
  0x33   : > { %s865_s27 = scalar_lea.hbm %s1243_s0, 4096  ;;  %p866_p7 = scmp.lt.u32.totalorder %s1093_s14, %s1243_s0 }
  0x34   : > { %p863_p3 = pnand %p862_p0, %p861_p13  ;;  %p867_p9 = scmp.lt.u32.totalorder %s865_s27, %s860_s16 }
  0x35   : > { %p869_p2 = scmp.lt.u32.totalorder %s860_s16, %s1093_s14 }
  0x36   : > { %p864_p5 = pneg %p863_p3  ;;  %p868_p11 = por %p867_p9, %p866_p7 }
  0x38   : > { %p870_p1 = por %p869_p2, %p868_p11 }
  0x3a   : > { %p871_p4 = pnand %p870_p1, %p864_p5 }
  0x3c   : > { %874 = shalt.err (!%p871_p4)
}
  0x3d   : > { %s875_s10 = scalar_lea.vmem %s1099_s6, 1024  ;;  %s965_s29 = smov [#allocation2]  }
  0x3e   : > { %p876_p6 = scmp.ne.s32.totalorder %s1099_s6, %s875_s10  ;;  %s880_s13 = sshll.u32 %s965_s29, 4  ;;  %s881_s13 = int_to_ptr.vmem [resolvable:$false] %s880_s13 }
  0x3f   : > { %s882_s28 = scalar_lea.vmem %s881_s13, 2048  ;;  %p883_p3 = scmp.lt.s32.totalorder %s1099_s6, %s881_s13 }
  0x40   : > { %p878_p8 = pnand %p876_p6, %p862_p0  ;;  %p884_p7 = scmp.lt.s32.totalorder %s882_s28, %s875_s10 }
  0x42   : > { %p879_p13 = pneg %p878_p8  ;;  %p885_p9 = por %p884_p7, %p883_p3 }
  0x44   : > { %p886_p11 = pnand %p885_p9, %p879_p13 }
  0x46   : > { %889 = shalt.err (!%p886_p11)
}
  0x47   : > { %s966_s16 = smov 256   ;;  %s967_s17 = smov 16  }
  0x48   : > { %760 = dma.hbm_to_vmem [thread:$0]  (!%p1095_p10), %s1093_s14, 1024, %s1099_s6, %s1101_s15, %s966_s16, %s966_s16, %s967_s17  }
  0x49   : > { %p1259_p0 = scmp.ne.s32.totalorder %s1254_s26, 0 }
  0x4a   : > { %s1132_s23 = sand.u32 (!%p1259_p0), 1, %s952_s19   ;;  %p1260_p5 = scmp.ne.s32.totalorder (!%p1259_p0), %s1252_s24, 0 }
  0x4b   : > { %222 = sbr.rel (%p1259_p0) target bundleno = 647 (0x287), region = 40  ;;  %s673_s27 = sshll.u32 (!%p1259_p0), %s1132_s23, 6 }
  0x4c   : > { %s225_s11 = scalar_lea.sflag (!%p1259_p0), [#allocation3], %s1132_s23  ;;  %s228_s12 = scalar_lea.vmem (!%p1259_p0), [#allocation2], %s673_s27 }
  0x52   : > { %935 = dma.done.wait (%p1260_p5), %s225_s11, 1024  }
  0x53   : > { %937 = vsyncadd (%p1260_p5), %s225_s11, 4294966272  ;;  %p1261_p2 = scmp.eq.s32.totalorder %s1022_s22, 0 }
  0x55   : > { %939 = dma.done.wait (%p1261_p2), [#allocation6], 2048   ;;  %p1262_p10 = pmov %p1261_p2 }
  0x56   : > { %v262_v0 = vld [vmem:[%s228_s12] sm:$0xff]  ;;  %v263_v1 = vld [vmem:[%s228_s12 + $0x8] sm:$0xff]  ;;  %v264_v5 = vld [vmem:[%s228_s12 + $0x10] sm:$0xff]  ;;  %v337_v59 = vlaneseq  ;;  %s675_s7 = sshll.u32 %s1132_s23, 5  ;;  %s700_s28 = sshll.u32 %s1022_s22, 9 }
  0x57   : > { %941 = vsyncadd (%p1262_p10), [#allocation6], 4294965248  ;;  %v266_v2 = vld [vmem:[%s228_s12 + $0x20] sm:$0xff]  ;;  %v270_v3 = vadd.f32 %v263_v1, %v262_v0  ;;  %v267_v4 = vld [vmem:[%s228_s12 + $0x28] sm:$0xff]  ;;  %s258_s29 = scalar_lea.vmem [#allocation7], %s675_s7  ;;  %s1200_s27 = scalar_lea.hbm %s1248_s5, %s700_s28 }
  0x58   : > { %v265_v6 = vld [vmem:[%s228_s12 + $0x18] sm:$0xff]  ;;  %v276_v7 = vadd.f32 %v267_v4, %v266_v2  ;;  %v268_v8 = vld [vmem:[%s228_s12 + $0x30] sm:$0xff]  ;;  %v808_v12 = vld [vmem:[#allocation5 + $0x40] sm:$0xff]   ;;  %s581_s13 = sshll.u32 %s258_s29, 4  ;;  %s568_s11 = scalar_lea.sflag [#allocation4], %s1132_s23  ;;  %s1195_s13 = int_to_ptr.vmem [resolvable:$true] %s581_s13 }
  0x59   : > { %v269_v9 = vld [vmem:[%s228_s12 + $0x38] sm:$0xff]  ;;  %271 = vadd.xlane.f32.xlu0 %v270_v3  ;;  %v273_v10 = vadd.f32 %v265_v6, %v264_v5  ;;  %v809_v13 = vld [vmem:[#allocation5] sm:$0xff]   ;;  %701 = vmatprep.subr.bf16.mxu0 %v808_v12  ;;  %v810_v42 = vld [vmem:[#allocation5 + $0x48] sm:$0xff]   ;;  %s890_s12 = scalar_lea.vmem %s1195_s13, 512  ;;  %s968_s22 = smov [#allocation7]  }
  0x5a   : > { %277 = vadd.xlane.f32.xlu1 %v276_v7  ;;  %v279_v11 = vadd.f32 %v269_v9, %v268_v8  ;;  %729 = vmatprep.subr.bf16.mxu1 %v808_v12  ;;  %v811_v43 = vld [vmem:[#allocation5 + $0x8] sm:$0xff]   ;;  %v812_v44 = vld [vmem:[#allocation5 + $0x50] sm:$0xff]   ;;  %v814_v46 = vld [vmem:[#allocation5 + $0x58] sm:$0xff]   ;;  %p891_p1 = scmp.ne.s32.totalorder %s1195_s13, %s890_s12  ;;  %s894_s24 = sshll.u32 %s968_s22, 4  ;;  %s895_s24 = int_to_ptr.vmem [resolvable:$false] %s894_s24 }
  0x5b   : > { %702 = vmatpush3.bf16.msra.mxu0 %v809_v13  ;;  %737 = vmatpush3.bf16.msra.mxu1 %v809_v13  ;;  %v813_v45 = vld [vmem:[#allocation5 + $0x10] sm:$0xff]   ;;  %v815_v47 = vld [vmem:[#allocation5 + $0x18] sm:$0xff]   ;;  %v816_v48 = vld [vmem:[#allocation5 + $0x60] sm:$0xff]   ;;  %s896_s26 = scalar_lea.vmem %s895_s24, 1024  ;;  %p897_p8 = scmp.lt.s32.totalorder %s1195_s13, %s895_s24 }
  0x5c   : > { %703 = vmatprep.subr.bf16.mxu0 %v810_v42  ;;  %730 = vmatprep.subr.bf16.mxu1 %v810_v42  ;;  %v817_v49 = vld [vmem:[#allocation5 + $0x20] sm:$0xff]   ;;  %v818_v50 = vld [vmem:[#allocation5 + $0x68] sm:$0xff]   ;;  %v820_v52 = vld [vmem:[#allocation5 + $0x70] sm:$0xff]   ;;  %p892_p4 = pnand %p891_p1, %p1084_p12  ;;  %p898_p13 = scmp.lt.s32.totalorder %s896_s26, %s890_s12 }
  0x5d   : > { %274 = vadd.xlane.f32.xlu0 %v273_v10  ;;  %v819_v51 = vld [vmem:[#allocation5 + $0x28] sm:$0xff]   ;;  %v821_v53 = vld [vmem:[#allocation5 + $0x30] sm:$0xff]   ;;  %v822_v54 = vld [vmem:[#allocation5 + $0x78] sm:$0xff]  }
  0x5e   : > { %280 = vadd.xlane.f32.xlu1 %v279_v11  ;;  %v823_v55 = vld [vmem:[#allocation5 + $0x38] sm:$0xff]   ;;  %v355_v13 = vld [vmem:[%s1245_s2] sm:$0x3]  ;;  %p893_p6 = pneg %p892_p4  ;;  %p899_p3 = por %p898_p13, %p897_p8 }
  0x5f   : > { %704 = vmatpush3.bf16.msra.mxu0 %v811_v43  ;;  %738 = vmatpush3.bf16.msra.mxu1 %v811_v43 }
  0x60   : > { %705 = vmatprep.subr.bf16.mxu0 %v812_v44  ;;  %731 = vmatprep.subr.bf16.mxu1 %v812_v44  ;;  %p900_p7 = pnand %p899_p3, %p893_p6 }
  0x63   : > { %706 = vmatpush3.bf16.msra.mxu0 %v813_v45  ;;  %739 = vmatpush3.bf16.msra.mxu1 %v813_v45 }
  0x64   : > { %707 = vmatprep.subr.bf16.mxu0 %v814_v46  ;;  %732 = vmatprep.subr.bf16.mxu1 %v814_v46 }
  0x67   : > { %708 = vmatpush3.bf16.msra.mxu0 %v815_v47  ;;  %740 = vmatpush3.bf16.msra.mxu1 %v815_v47 }
  0x68   : > { %709 = vmatprep.subr.bf16.mxu0 %v816_v48  ;;  %733 = vmatprep.subr.bf16.mxu1 %v816_v48 }
  0x6b   : > { %710 = vmatpush3.bf16.msra.mxu0 %v817_v49  ;;  %741 = vmatpush3.bf16.msra.mxu1 %v817_v49 }
  0x6c   : > { %711 = vmatprep.subr.bf16.mxu0 %v818_v50  ;;  %734 = vmatprep.subr.bf16.mxu1 %v818_v50 }
  0x6f   : > { %712 = vmatpush3.bf16.msra.mxu0 %v819_v51  ;;  %742 = vmatpush3.bf16.msra.mxu1 %v819_v51 }
  0x70   : > { %713 = vmatprep.subr.bf16.mxu0 %v820_v52  ;;  %735 = vmatprep.subr.bf16.mxu1 %v820_v52 }
  0x73   : > { %714 = vmatpush3.bf16.msra.mxu0 %v821_v53  ;;  %743 = vmatpush3.bf16.msra.mxu1 %v821_v53 }
  0x74   : > { %715 = vmatprep.subr.bf16.mxu0 %v822_v54  ;;  %736 = vmatprep.subr.bf16.mxu1 %v822_v54 }
  0x77   : > { %716 = vmatpush3.bf16.msra.mxu0 %v823_v55  ;;  %744 = vmatpush3.bf16.msra.mxu1 %v823_v55 }
  0xe6   : > { %v272_v14 = vpop.xlane.xlu0 %271 }
  0xe7   : > { %v283_v15 = vmul.f32 0.00390625, %v272_v14  ;;  %v278_v16 = vpop.xlane.xlu1 %277 }
  0xe8   : > { %v285_v17 = vmul.f32 0.00390625, %v278_v16 }
  0xe9   : > { %v1144_v18 = vsub.f32 %v262_v0, %v283_v15  ;;  %v1146_v19 = vsub.f32 %v263_v1, %v283_v15 }
  0xea   : > { %v1148_v20 = vsub.f32 %v266_v2, %v285_v17  ;;  %v1150_v21 = vsub.f32 %v267_v4, %v285_v17  ;;  %v275_v22 = vpop.xlane.xlu0 %274  ;;  %v338_v2 = vshrl.u32 %v337_v59, 7 }
  0xeb   : > { %v284_v23 = vmul.f32 0.00390625, %v275_v22  ;;  %v281_v24 = vpop.xlane.xlu1 %280  ;;  %v295_v25 = vmul.f32 %v1144_v18, %v1144_v18  ;;  %v296_v26 = vmul.f32 %v1146_v19, %v1146_v19 }
  0xec   : > { %v286_v27 = vmul.f32 0.00390625, %v281_v24  ;;  %v299_v28 = vmul.f32 %v1148_v20, %v1148_v20  ;;  %v300_v29 = vmul.f32 %v1150_v21, %v1150_v21  ;;  %v343_v7 = vsub.s32 1, %v338_v2 }
  0xed   : > { %v1160_v30 = vsub.f32 %v264_v5, %v284_v23  ;;  %v1162_v31 = vsub.f32 %v265_v6, %v284_v23  ;;  %v303_v32 = vadd.f32 %v296_v26, %v295_v25  ;;  %v339_v6 = vsub.s32 0, %v338_v2 }
  0xee   : > { %v1164_v33 = vsub.f32 %v268_v8, %v286_v27  ;;  %v1166_v34 = vsub.f32 %v269_v9, %v286_v27  ;;  %v309_v35 = vadd.f32 %v300_v29, %v299_v28  ;;  %v335_v8 = vld [vmem:[%s1244_s1] sm:$0x3]  ;;  %v364_v22 = vrot.slane %v355_v13, %v343_v7 }
  0xef   : > { %304 = vadd.xlane.f32.xlu0 %v303_v32  ;;  %v297_v36 = vmul.f32 %v1160_v30, %v1160_v30  ;;  %v298_v37 = vmul.f32 %v1162_v31, %v1162_v31  ;;  %v340_v10 = vrot.slane %v335_v8, %v339_v6  ;;  %v344_v11 = vrot.slane %v335_v8, %v343_v7 }
  0xf0   : > { %v301_v38 = vmul.f32 %v1164_v33, %v1164_v33  ;;  %v302_v39 = vmul.f32 %v1166_v34, %v1166_v34  ;;  %v360_v17 = vrot.slane %v355_v13, %v339_v6 }
  0xf1   : > { %v306_v40 = vadd.f32 %v298_v37, %v297_v36 }
  0xf2   : > { %v312_v41 = vadd.f32 %v302_v39, %v301_v38 }
  0xf3   : > { %310 = vadd.xlane.f32.xlu0 %v309_v35  ;;  %307 = vadd.xlane.f32.xlu1 %v306_v40 }
  0xf7   : > { %313 = vadd.xlane.f32.xlu1 %v312_v41 }
 0x17c   : > { %v305_v56 = vpop.xlane.xlu0 %304 }
 0x17d   : > { %v315_v57 = vmul.f32 0.00390625, %v305_v56 }
 0x17f   : > { %v319_v58 = vadd.f32 1e-05, %v315_v57 }
 0x180   : > { %v308_v60 = vpop.xlane.xlu1 %307  ;;  %v311_v61 = vpop.xlane.xlu0 %310 }
 0x181   : > { %824 = vrsqrt.f32 %v319_v58  ;;  %v316_v62 = vmul.f32 0.00390625, %v308_v60  ;;  %v317_v63 = vmul.f32 0.00390625, %v311_v61 }
 0x183   : > { %v320_v0 = vadd.f32 1e-05, %v316_v62  ;;  %v321_v1 = vadd.f32 1e-05, %v317_v63 }
 0x184   : > { %v314_v3 = vpop.xlane.xlu1 %313 }
 0x185   : > { %826 = vrsqrt.f32 %v320_v0  ;;  %v318_v4 = vmul.f32 0.00390625, %v314_v3 }
 0x186   : > { %828 = vrsqrt.f32 %v321_v1 }
 0x187   : > { %v322_v5 = vadd.f32 1e-05, %v318_v4 }
 0x189   : > { %830 = vrsqrt.f32 %v322_v5 }
 0x18b   : > { %v825_v9 = vpop.eup %824 }
 0x18c   : > { %v328_v12 = vmul.f32 %v825_v9, %v1146_v19  ;;  %v327_v14 = vmul.f32 %v825_v9, %v1144_v18 }
 0x18e   : > { %v348_v16 = vmul.f32 %v344_v11, %v328_v12  ;;  %v347_v23 = vmul.f32 %v340_v10, %v327_v14 }
 0x18f   : > { %v827_v15 = vpop.eup %826 }
 0x190   : > { %v829_v24 = vpop.eup %828  ;;  %v330_v25 = vmul.f32 %v827_v15, %v1162_v31  ;;  %v329_v26 = vmul.f32 %v827_v15, %v1160_v30  ;;  %v368_v35 = vadd.f32 %v364_v22, %v348_v16  ;;  %v367_v36 = vadd.f32 %v360_v17, %v347_v23 }
 0x191   : > { %v332_v27 = vmul.f32 %v829_v24, %v1150_v21  ;;  %v331_v19 = vmul.f32 %v829_v24, %v1148_v20 }
 0x192   : > { %v350_v28 = vmul.f32 %v344_v11, %v330_v25  ;;  %v349_v29 = vmul.f32 %v340_v10, %v329_v26 }
 0x193   : > { %v831_v32 = vpop.eup %830  ;;  %v352_v18 = vmul.f32 %v344_v11, %v332_v27  ;;  %v351_v37 = vmul.f32 %v340_v10, %v331_v19 }
 0x194   : > { %v370_v38 = vadd.f32 %v364_v22, %v350_v28  ;;  %v369_v39 = vadd.f32 %v360_v17, %v349_v29  ;;  %v334_v40 = vmul.f32 %v831_v32, %v1166_v34  ;;  %v333_v41 = vmul.f32 %v831_v32, %v1164_v33  ;;  %v676_v33 = vld [vmem:[%s1247_s4] ss:$0 sm:$0xff] }
 0x195   : > { %v372_v20 = vadd.f32 %v364_v22, %v352_v18  ;;  %v371_v44 = vadd.f32 %v360_v17, %v351_v37 }
 0x196   : > { %v376_v31 = vpack.c.bf16 %v370_v38, %v368_v35  ;;  %v375_v30 = vpack.c.bf16 %v369_v39, %v367_v36  ;;  %v354_v42 = vmul.f32 %v344_v11, %v334_v40  ;;  %v353_v21 = vmul.f32 %v340_v10, %v333_v41 }
 0x198   : > { %546 = vmatprep.mubr.bf16.mxu0 %v376_v31  ;;  %v374_v43 = vadd.f32 %v364_v22, %v354_v42  ;;  %v373_v45 = vadd.f32 %v360_v17, %v353_v21 }
 0x199   : > { %547 = vmatmul.mubr.bf16.vlgmr.msra.gmra.mrb[0].mxu0 %v375_v30 }
 0x19a   : > { %v378_v46 = vpack.c.bf16 %v374_v43, %v372_v20  ;;  %v377_v47 = vpack.c.bf16 %v373_v45, %v371_v44 }
 0x19c   : > { %554 = vmatprep.mubr.bf16.mxu1 %v378_v46 }
 0x19d   : > { %555 = vmatmul.mubr.bf16.vlgmr.msra.gmra.mrb[0].mxu1 %v377_v47 }
 0x26c   : > { %v717_v48 = vpop.f32.mrb[0].mxu0 }
 0x26d   : > { %v718_v34 = vpop.f32.mrb[1].mxu0 }
 0x26e   : > { %v719_v49 = vadd.f32 %v718_v34, %v717_v48  ;;  %v720_v50 = vpop.f32.mrb[2].mxu0 }
 0x26f   : > { %v721_v51 = vpop.f32.mrb[3].mxu0 }
 0x270   : > { %v549_v52 = vadd.f32 %v719_v49, %v676_v33  ;;  %v722_v53 = vadd.f32 %v721_v51, %v720_v50  ;;  %v723_v54 = vpop.f32.mrb[0].mxu1 }
 0x271   : > { %v724_v55 = vpop.f32.mrb[1].mxu1 }
 0x272   : > { %563 = vst [vmem:[%s258_s29] sm:$0xff] %v549_v52  ;;  %v552_v56 = vadd.f32 %v722_v53, %v676_v33  ;;  %v725_v57 = vadd.f32 %v724_v55, %v723_v54  ;;  %v726_v58 = vpop.f32.mrb[2].mxu1 }
 0x273   : > { %v727_v59 = vpop.f32.mrb[3].mxu1 }
 0x274   : > { %564 = vst [vmem:[%s258_s29 + $0x8] sm:$0xff] %v552_v56  ;;  %v557_v60 = vadd.f32 %v725_v57, %v676_v33  ;;  %v728_v61 = vadd.f32 %v727_v59, %v726_v58 }
 0x276   : > { %565 = vst [vmem:[%s258_s29 + $0x10] sm:$0xff] %v557_v60  ;;  %v560_v62 = vadd.f32 %v728_v61, %v676_v33 }
 0x278   : > { %566 = vst [vmem:[%s258_s29 + $0x18] sm:$0xff] %v560_v62 }
 0x279   : > { %903 = shalt.err (!%p900_p7)
}
 0x27a   : > { %s904_s14 = scalar_lea.hbm %s1200_s27, 512  ;;  %s908_s15 = scalar_lea.hbm %s1248_s5, 2048 }
 0x27b   : > { %p905_p9 = scmp.ne.s32.totalorder %s1200_s27, %s904_s14  ;;  %p909_p5 = scmp.lt.u32.totalorder %s1200_s27, %s1248_s5 }
 0x27c   : > { %p910_p2 = scmp.lt.u32.totalorder %s908_s15, %s904_s14  ;;  %p912_p1 = scmp.lt.u32.totalorder %s904_s14, %s1200_s27 }
 0x27d   : > { %p906_p11 = pnand %p905_p9, %p1084_p12 }
 0x27e   : > { %p911_p10 = por %p910_p2, %p909_p5 }
 0x27f   : > { %p907_p0 = pneg %p906_p11 }
 0x280   : > { %p913_p4 = por %p912_p1, %p911_p10 }
 0x282   : > { %p914_p6 = pnand %p913_p4, %p907_p0 }
 0x284   : > { %917 = shalt.err (!%p914_p6)
}
 0x285   : > { %s969_s28 = smov 128   ;;  %s970_s16 = smov 8  }
 0x286   : > { %751 = dma.vmem_to_hbm [thread:$0]  (%p1084_p12), %s1195_s13, 512, %s1200_s27, %s568_s11, %s969_s28, %s969_s28, %s970_s16  }
 0x287 PF: > { %p768_p8 = scmp.ge.s32.totalorder %s960_s21, 2  ;;  %s596_s17 = sand.u32 1, %s948_s18  }
 0x288   : > { %p1263_p13 = scmp.ne.s32.totalorder %s1253_s25, 0  ;;  %s597_s12 = scalar_lea.sflag [#allocation4], %s596_s17 }
 0x28a   : > { %p762_p3 = pnand %p768_p8, %p1263_p13 }
 0x28c   : > { %943 = dma.done.wait (!%p762_p3), %s597_s12, 512  }
 0x28d   : > { %945 = vsyncadd (!%p762_p3), %s597_s12, 4294966784  ;;  %p19_p7 = scmp.ge.s32.totalorder %s1054_s30, 6   ;;  %s1264_s18 = smov %s952_s19 }
 0x28e   : > { %s1265_s19 = smov %s956_s20  ;;  %s1266_s20 = smov %s1080_s8 }
 0x28f   : > { %s1267_s21 = smov %s1054_s30  ;;  %21 = sbr.rel (!%p19_p7) target bundleno = 6 (0x6), region = 89 }
 0x296   :  { %602 = vsyncpa [#allocation3], 1 }
 0x297   :  { %604 = vsyncpa [#allocation3 + $0x1], 1 }
 0x298   :  { %605 = vsyncpa [#allocation6], 1 }
 0x299   :  { %606 = vsyncpa [#allocation4], 1 }
 0x29a   :  { %608 = vsyncpa [#allocation4 + $0x1], 1 }

</bundles_post_ra>
